<compile_context>
chip_gen: v7x
topology: tpu7x:2x2x1
jax: 0.10.0
libtpu: 0.0.40
codegen_flags: <defaults>
</compile_context>

<pallas_src>
import jax
import jax.numpy as jnp
from jax.experimental import pallas as pl
from jax.experimental.pallas import tpu as pltpu

MIN_VALUE = -1.0
MAX_VALUE = 1.0

DEFAULT_BLOCK_B = 65536   # lanes per batch tile in the large-B path
SMALL_B_MAX = 4096        # threshold for the single-block natural-layout path


def _round_up(v, m):
    return ((v + m - 1) // m) * m


def _linear_clamp_small_kernel(x_ref, wT_ref, b_ref, o_ref):
    # x_ref: (B, IN)  natural layout        wT_ref: (IN, OUT)
    # b_ref: (1, OUT)                       o_ref:  (B, OUT)
    x = x_ref[...]
    wT = wT_ref[...]
    y = b_ref[...]                                  # (1, OUT) -> broadcasts
    for k in range(x_ref.shape[1]):                 # K = 3, unrolled VPU FMAs
        y = y + x[:, k:k + 1] * wT[k:k + 1, :]      # (B,1)*(1,OUT) -> (B,OUT)
    o_ref[...] = jnp.clip(y, MIN_VALUE, MAX_VALUE).astype(o_ref.dtype)


def _linear_clamp_wide_kernel(xT_ref, w_ref, b_ref, oT_ref):
    # xT_ref: (IN, TB) VMEM, batch on the lane axis
    # w_ref:  (OUT, IN) SMEM scalars        b_ref: (OUT,) SMEM scalars
    # oT_ref: (OUT, TB) VMEM, lane-dense unmasked stores
    in_features = xT_ref.shape[0]
    out_features = oT_ref.shape[0]
    for o in range(out_features):
        # y^T[o, :] = b[o] + sum_k w[o, k] * x^T[k, :]   (scalar x vector FMAs)
        acc = b_ref[o] + w_ref[o, 0] * xT_ref[0:1, :]
        for k in range(1, in_features):
            acc = acc + w_ref[o, k] * xT_ref[k:k + 1, :]
        # clamp_min then clamp_max == clip
        oT_ref[o:o + 1, :] = jnp.clip(acc, MIN_VALUE, MAX_VALUE).astype(oT_ref.dtype)


def linear_clamp(x, w, b, block_b=DEFAULT_BLOCK_B, small_b_max=SMALL_B_MAX):
    """y = clamp(x @ w.T + b, -1, 1).  x: (B, IN), w: (OUT, IN), b: (OUT,)."""
    assert block_b % 128 == 0, "batch tile must be a multiple of 128 lanes"
    B, IN = x.shape
    OUT = w.shape[0]

    # ---- Small-B fast path: one kernel, natural layout, no layout plumbing.
    if B <= small_b_max:
        return pl.pallas_call(
            _linear_clamp_small_kernel,
            out_shape=jax.ShapeDtypeStruct((B, OUT), x.dtype),
            grid=(1,),
            in_specs=[
                pl.BlockSpec((B, IN), lambda i: (0, 0)),
                pl.BlockSpec((IN, OUT), lambda i: (0, 0)),
                pl.BlockSpec((1, OUT), lambda i: (0, 0)),
            ],
            out_specs=pl.BlockSpec((B, OUT), lambda i: (0, 0)),
        )(x, w.T, b.reshape(1, OUT))

    # ---- Large-B path: lane-dense transposed layout, big batch tiles.
    # Keep >= ~4 tiles so the "parallel" axis shards across TensorCores (v7x),
    # but never below 512 lanes and never above block_b.  Double-buffered VMEM
    # is ~128*tb bytes (input padded to 8 sublanes + output), so tb=65536 stays
    # well under v5e's 16 MiB default scoped VMEM and v7x's 64 MiB physical.
    tb = min(block_b, max(_round_up(pl.cdiv(B, 4), 128), 512))
    grid = (pl.cdiv(B, tb),)   # ragged last tile handled by Pallas masking

    xT = x.T                   # (IN, B): batch axis on the 128-lane dimension

    oT = pl.pallas_call(
        _linear_clamp_wide_kernel,
        out_shape=jax.ShapeDtypeStruct((OUT, B), x.dtype),
        grid=grid,
        in_specs=[
            # (IN, tb): sublane dim == full array dim (3), lane dim mult. of 128
            pl.BlockSpec((IN, tb), lambda i: (0, i)),
            # weight / bias stay resident as SMEM scalars
            pl.BlockSpec(memory_space=pltpu.MemorySpace.SMEM),
            pl.BlockSpec(memory_space=pltpu.MemorySpace.SMEM),
        ],
        out_specs=pl.BlockSpec((OUT, tb), lambda i: (0, i)),
        compiler_params=pltpu.CompilerParams(
            dimension_semantics=("parallel",),   # batch tiles are independent
        ),
    )(xT, w, b)

    return oT.T                # back to the PyTorch (B, OUT) layout


if __name__ == "__main__":
    key = jax.random.PRNGKey(0)
    kw, kb, kx1, kx2, kx3 = jax.random.split(key, 5)

    IN, OUT = 3, 4

    # Deterministic Linear(3, 4) parameters (PyTorch-style uniform init,
    # PyTorch weight layout (OUT, IN)).
    bound = 1.0 / (IN ** 0.5)
    w = jax.random.uniform(kw, (OUT, IN), minval=-bound, maxval=bound,
                           dtype=jnp.float32)
    b = jax.random.uniform(kb, (OUT,), minval=-bound, maxval=bound,
                           dtype=jnp.float32)

    def ref(x):
        return jnp.clip(x @ w.T + b, MIN_VALUE, MAX_VALUE)

    # 1) Spec-shaped input: torch.randn(1, 3) -> small-B fast path, grid=(1,)
    x1 = jax.random.normal(kx1, (1, IN), dtype=jnp.float32)
    out1 = linear_clamp(x1, w, b)
    jax.block_until_ready(out1)
    assert out1.shape == (1, OUT)
    assert jnp.allclose(out1, ref(x1), atol=1e-5, rtol=1e-5)

    # 2) Modest batch: still the single-kernel fast path (no pad/transpose).
    x2 = jax.random.normal(kx2, (300, IN), dtype=jnp.float32)
    out2 = linear_clamp(x2, w, b)
    jax.block_until_ready(out2)
    assert out2.shape == (300, OUT)
    assert jnp.allclose(out2, ref(x2), atol=1e-5, rtol=1e-5)

    # 3) Exercise the large-B lane-dense path: multi-tile grid (tb=1280,
    #    grid=(4,)) with a ragged last tile; SMEM-resident weights.
    x3 = jax.random.normal(kx3, (5000, IN), dtype=jnp.float32)
    out3 = linear_clamp(x3, w, b)
    jax.block_until_ready(out3)
    assert out3.shape == (5000, OUT)
    assert jnp.allclose(out3, ref(x3), atol=1e-5, rtol=1e-5)

    print("KERNEL_OK")
</pallas_src>

<mosaic_0001>
module attributes {stable_mosaic.version = 11 : i64} {
  func.func @_linear_clamp_small_kernel(%arg0: i32, %arg1: memref<1x3xf32, #tpu.memory_space<vmem>>, %arg2: memref<3x4xf32, #tpu.memory_space<vmem>>, %arg3: memref<1x4xf32, #tpu.memory_space<vmem>>, %arg4: memref<1x4xf32, #tpu.memory_space<vmem>>) attributes {dimension_semantics = [#tpu.dimension_semantics<arbitrary>], iteration_bounds = array<i64: 1>, scalar_prefetch = 0 : i64, scratch_operands = 0 : i64, tpu.core_type = #tpu.core_type<tc>, window_params = [{pipeline_mode = #tpu.pipeline_mode<synchronous>, transform_indices = @transform_0, window_bounds = array<i64: 1, 3>}, {pipeline_mode = #tpu.pipeline_mode<synchronous>, transform_indices = @transform_1, window_bounds = array<i64: 3, 4>}, {pipeline_mode = #tpu.pipeline_mode<synchronous>, transform_indices = @transform_2, window_bounds = array<i64: 1, 4>}, {pipeline_mode = #tpu.pipeline_mode<synchronous>, transform_indices = @transform_3, window_bounds = array<i64: 1, 4>}]} {
    %c0 = arith.constant 0 : index
    %c0_0 = arith.constant 0 : index
    %0 = vector.load %arg1[%c0, %c0_0] : memref<1x3xf32, #tpu.memory_space<vmem>>, vector<1x3xf32>
    %c0_1 = arith.constant 0 : index
    %c0_2 = arith.constant 0 : index
    %1 = vector.load %arg2[%c0_1, %c0_2] : memref<3x4xf32, #tpu.memory_space<vmem>>, vector<3x4xf32>
    %c0_3 = arith.constant 0 : index
    %c0_4 = arith.constant 0 : index
    %2 = vector.load %arg3[%c0_3, %c0_4] : memref<1x4xf32, #tpu.memory_space<vmem>>, vector<1x4xf32>
    %3 = vector.extract_strided_slice %0 {offsets = [0, 0], sizes = [1, 1], strides = [1, 1]} : vector<1x3xf32> to vector<1x1xf32>
    %4 = vector.extract_strided_slice %1 {offsets = [0, 0], sizes = [1, 4], strides = [1, 1]} : vector<3x4xf32> to vector<1x4xf32>
    %5 = vector.broadcast %3 : vector<1x1xf32> to vector<1x4xf32>
    %6 = arith.mulf %5, %4 : vector<1x4xf32>
    %7 = arith.addf %2, %6 : vector<1x4xf32>
    %8 = vector.extract_strided_slice %0 {offsets = [0, 1], sizes = [1, 1], strides = [1, 1]} : vector<1x3xf32> to vector<1x1xf32>
    %9 = vector.extract_strided_slice %1 {offsets = [1, 0], sizes = [1, 4], strides = [1, 1]} : vector<3x4xf32> to vector<1x4xf32>
    %10 = vector.broadcast %8 : vector<1x1xf32> to vector<1x4xf32>
    %11 = arith.mulf %10, %9 : vector<1x4xf32>
    %12 = arith.addf %7, %11 : vector<1x4xf32>
    %13 = vector.extract_strided_slice %0 {offsets = [0, 2], sizes = [1, 1], strides = [1, 1]} : vector<1x3xf32> to vector<1x1xf32>
    %14 = vector.extract_strided_slice %1 {offsets = [2, 0], sizes = [1, 4], strides = [1, 1]} : vector<3x4xf32> to vector<1x4xf32>
    %15 = vector.broadcast %13 : vector<1x1xf32> to vector<1x4xf32>
    %16 = arith.mulf %15, %14 : vector<1x4xf32>
    %17 = arith.addf %12, %16 : vector<1x4xf32>
    %cst = arith.constant -1.000000e+00 : f32
    %cst_5 = arith.constant 1.000000e+00 : f32
    %18 = vector.broadcast %cst : f32 to vector<1x4xf32>
    %19 = arith.maximumf %18, %17 : vector<1x4xf32>
    %20 = vector.broadcast %cst_5 : f32 to vector<1x4xf32>
    %21 = arith.minimumf %20, %19 : vector<1x4xf32>
    %c0_6 = arith.constant 0 : index
    %c0_7 = arith.constant 0 : index
    %22 = vector.load %arg4[%c0_6, %c0_7] : memref<1x4xf32, #tpu.memory_space<vmem>>, vector<1x4xf32>
    tpu.vector_store %arg4[%c0_6, %c0_7], %21 {strides = array<i32>} : memref<1x4xf32, #tpu.memory_space<vmem>>, vector<1x4xf32>,
    return
  }
  func.func @transform_0(%arg0: i32) -> (i32, i32) {
    %c0_i32 = arith.constant 0 : i32
    %c0_i32_0 = arith.constant 0 : i32
    %c0_i32_1 = arith.constant 0 : i32
    return %c0_i32, %c0_i32_0 : i32, i32
  }
  func.func @transform_1(%arg0: i32) -> (i32, i32) {
    %c0_i32 = arith.constant 0 : i32
    %c0_i32_0 = arith.constant 0 : i32
    %c0_i32_1 = arith.constant 0 : i32
    return %c0_i32, %c0_i32_0 : i32, i32
  }
  func.func @transform_2(%arg0: i32) -> (i32, i32) {
    %c0_i32 = arith.constant 0 : i32
    %c0_i32_0 = arith.constant 0 : i32
    %c0_i32_1 = arith.constant 0 : i32
    return %c0_i32, %c0_i32_0 : i32, i32
  }
  func.func @transform_3(%arg0: i32) -> (i32, i32) {
    %c0_i32 = arith.constant 0 : i32
    %c0_i32_0 = arith.constant 0 : i32
    %c0_i32_1 = arith.constant 0 : i32
    return %c0_i32, %c0_i32_0 : i32, i32
  }
}

</mosaic_0001>

<bundles_post_ra>
// kernel: tpu_custom_call.1
= control target key start
LH: loop header
LB: loop body
LE: loop exit
PB: predicated region body
PF: predicated region fallthrough
CT: control target
= control target key end

     0   :  { %8 = vsyncpa [#allocation3], 0  ;;  %s276_s0 = inlined_call_operand.hbm [shape: f32[1,3], index: 0, kind: input, shape index: {}]   ;;  %s277_s1 = inlined_call_operand.hbm [shape: f32[3,4], index: 1, kind: input, shape index: {}]   ;;  %s278_s2 = inlined_call_operand.vmem [shape: f32[1,4], index: 2, kind: input, shape index: {}]   ;;  %s279_s3 = inlined_call_operand.hbm [shape: f32[1,4], index: 3, kind: output, shape index: {}]  }
   0x1   :  { %9 = vsyncpa [#allocation6], 0 }
   0x2   :  { %10 = vsyncpa [#allocation4], 0  ;;  %s210_s12 = smov [#allocation2]   ;;  %s211_s14 = smov [#allocation5]  }
   0x3   :  { %s17_s13 = sshll.u32 %s210_s12, 4  ;;  %s27_s15 = sshll.u32 %s211_s14, 4  ;;  %s18_s13 = int_to_ptr.vmem [resolvable:$true] %s17_s13  ;;  %s28_s15 = int_to_ptr.vmem [resolvable:$true] %s27_s15 }
   0x4   :  { %s138_s18 = scalar_lea.hbm %s276_s0, 16 }
   0x5   :  { %p139_p0 = scmp.ne.s32.totalorder %s276_s0, %s138_s18  ;;  %p142_p1 = scmp.lt.u32.totalorder %s138_s18, %s276_s0 }
   0x7   :  { %p144_p2 = pnand %p142_p1, %p139_p0 }
   0x9   :  { %147 = shalt.err (!%p144_p2)
}
   0xa   :  { %s148_s23 = scalar_lea.vmem %s18_s13, 16  ;;  %s152_s24 = scalar_lea.vmem %s18_s13, 32 }
   0xb   :  { %p149_p3 = scmp.ne.s32.totalorder %s18_s13, %s148_s23  ;;  %p153_p4 = scmp.lt.s32.totalorder %s18_s13, %s18_s13 }
   0xc   :  { %p154_p5 = scmp.lt.s32.totalorder %s152_s24, %s148_s23 }
   0xe   :  { %p155_p6 = por %p154_p5, %p153_p4 }
  0x10   :  { %p156_p7 = pnand %p155_p6, %p149_p3 }
  0x12   :  { %159 = shalt.err (!%p156_p7)
}
  0x13   :  { %20 = dma.hbm_to_vmem [thread:$0]  %s276_s0, 16, %s18_s13, [#allocation3]  }
  0x14   :  { %s160_s29 = scalar_lea.hbm %s277_s1, 64 }
  0x15   :  { %p161_p8 = scmp.ne.s32.totalorder %s277_s1, %s160_s29  ;;  %p164_p9 = scmp.lt.u32.totalorder %s160_s29, %s277_s1 }
  0x17   :  { %p166_p10 = pnand %p164_p9, %p161_p8 }
  0x19   :  { %169 = shalt.err (!%p166_p10)
}
  0x1a   :  { %s170_s7 = scalar_lea.vmem %s28_s15, 64  ;;  %p175_p12 = scmp.lt.s32.totalorder %s28_s15, %s28_s15 }
  0x1b   :  { %p171_p11 = scmp.ne.s32.totalorder %s28_s15, %s170_s7  ;;  %p176_p13 = scmp.lt.s32.totalorder %s170_s7, %s170_s7 }
  0x1d   :  { %p177_p0 = por %p176_p13, %p175_p12 }
  0x1f   :  { %p178_p1 = pnand %p177_p0, %p171_p11 }
  0x21   :  { %181 = shalt.err (!%p178_p1)
}
  0x22   :  { %30 = dma.hbm_to_vmem [thread:$0]  %s277_s1, 64, %s28_s15, [#allocation6]  }
  0x23   :  { %204 = dma.done.wait [#allocation3], 16  }
  0x24   :  { %205 = vsyncadd [#allocation3], 4294967280 }
  0x25   :  { %206 = dma.done.wait [#allocation6], 64  }
  0x26   :  { %207 = vsyncadd [#allocation6], 4294967232  ;;  %v212_v0 = vmov 1   ;;  %v213_v1 = vmov 0   ;;  %v39_v2 = vld [vmem:[#allocation2] sm:$0x1]  ;;  %v47_v4 = vlaneseq }
  0x27   :  { %135 = vset.pattern.permute.xlu0 %v212_v0  ;;  %137 = vset.pattern.permute.xlu1 %v213_v1  ;;  %v214_v3 = vmov 2   ;;  %v215_v6 = vmov 1966171168   ;;  %v40_v10 = vld [vmem:[#allocation5] sm:$0x7]  ;;  %s216_s10 = smov [#allocation7]  }
  0x28   :  { %54 = vperm.xlu0 %135, %v39_v2   ;;  %44 = vperm.xlu1 %137, %v39_v2   ;;  %v48_v5 = vshrl.u32 %v47_v4, 7  ;;  %v64_v7 = vunpack.c.l.s4 %v215_v6  ;;  %v41_v22 = vld [vmem:[%s278_s2] sm:$0x1]  ;;  %s117_s11 = sshll.u32 %s216_s10, 4  ;;  %vm109_vm0 = vcmask 24576   ;;  %s118_s11 = int_to_ptr.vmem [resolvable:$true] %s117_s11 }
  0x29   :  { %s182_s12 = scalar_lea.vmem %s118_s11, 16  ;;  %s186_s13 = scalar_lea.vmem %s118_s11, 32 }
  0x2a   :  { %v49_v8 = vsub.s32 0, %v48_v5  ;;  %v65_v9 = vunpack.c.0.s8 %v64_v7  ;;  %p183_p2 = scmp.ne.s32.totalorder %s118_s11, %s182_s12  ;;  %p187_p3 = scmp.lt.s32.totalorder %s118_s11, %s118_s11 }
  0x2b   :  { %p188_p4 = scmp.lt.s32.totalorder %s186_s13, %s182_s12 }
  0x2c   :  { %136 = vset.pattern.permute.xlu0 %v214_v3  ;;  %v68_v13 = vsub.s32 %v65_v9, %v48_v5 }
  0x2d   :  { %81 = vperm.xlu0 %136, %v39_v2   ;;  %p189_p5 = por %p188_p4, %p187_p3 }
  0x2f   :  { %p190_p6 = pnand %p189_p5, %p183_p2 }
  0xa7   :  { %v55_v11 = vpop.permute.xlu0 %54  ;;  %v45_v12 = vpop.permute.xlu1 %44 }
  0xa8   :  { %v60_v14 = vrot.slane %v55_v11, %v49_v8  ;;  %v50_v15 = vrot.slane %v45_v12, %v49_v8 }
  0xaa   :  { %v61_v16 = vmul.f32 %v60_v14, %v40_v10  ;;  %v51_v19 = vmul.f32 %v50_v15, %v40_v10 }
  0xac   :  { %v69_v17 = vrot.slane %v61_v16, %v68_v13  ;;  %v82_v18 = vpop.permute.xlu0 %81  ;;  %v52_v25 = vadd.f32 %v51_v19, %v41_v22 }
  0xad   :  { %v87_v20 = vrot.slane %v82_v18, %v49_v8 }
  0xae   :  { %v70_v21 = vcombine.high %v69_v17, %v69_v17 }
  0xaf   :  { %v88_v23 = vmul.f32 %v87_v20, %v40_v10 }
  0xb0   :  { %v77_v24 = vrot.slane %v70_v21, %v68_v13 }
  0xb1   :  { %v96_v26 = vrot.slane %v88_v23, %v68_v13 }
  0xb2   :  { %v79_v28 = vadd.f32 %v77_v24, %v52_v25 }
  0xb3   :  { %v103_v27 = vrot.slane %v96_v26, %v68_v13 }
  0xb5   :  { %v104_v29 = vcombine.high %v103_v27, %v103_v27 }
  0xb7   :  { %v106_v30 = vadd.f32 %v104_v29, %v79_v28 }
  0xb9   :  { %v127_v31 = vclamps-f32 %v106_v30, 1.0 }
  0xbb   :  { %110 = vst.msk [vmem:[#allocation7] sm:$0x1] %vm109_vm0, %v127_v31 }
  0xbc   :  { %193 = shalt.err (!%p190_p6)
}
  0xbd   :  { %s194_s15 = scalar_lea.hbm %s279_s3, 16 }
  0xbe   :  { %p195_p7 = scmp.ne.s32.totalorder %s279_s3, %s194_s15  ;;  %p198_p8 = scmp.lt.u32.totalorder %s194_s15, %s279_s3 }
  0xc0   :  { %p200_p9 = pnand %p198_p8, %p195_p7 }
  0xc2   :  { %203 = shalt.err (!%p200_p9)
}
  0xc3   :  { %120 = dma.vmem_to_hbm [thread:$0]  %s118_s11, 16, %s279_s3, [#allocation4]  }
  0xc4   :  { %208 = dma.done.wait [#allocation4], 16  }
  0xc5   :  { %209 = vsyncadd [#allocation4], 4294967280 }
  0xc6   :  { %124 = vsyncpa [#allocation3], 1 }
  0xc7   :  { %125 = vsyncpa [#allocation6], 1 }
  0xc8   :  { %126 = vsyncpa [#allocation4], 1 }

</bundles_post_ra>
